<compile_context>
chip_gen: v7x
topology: tpu7x:2x2x1
jax: 0.10.0
libtpu: 0.0.40
codegen_flags: <defaults>
</compile_context>

<pallas_src>
import math

import jax
import jax.numpy as jnp
from jax.experimental import pallas as pl
from jax.experimental.pallas import tpu as pltpu


_VMEM_LIMIT = 48 * 1024 * 1024   # fits v5e/v6e (128 MiB) and v7x (64 MiB) VMEM


# ----------------------------------------------------------------------------
# Stage 1: fused linear projection  y = x @ W + b  on a flattened token slab.
# ----------------------------------------------------------------------------
def _linear_kernel(x_ref, w_ref, b_ref, o_ref):
    y = jnp.dot(x_ref[...], w_ref[...], preferred_element_type=jnp.float32)
    o_ref[...] = (y + b_ref[...]).astype(o_ref.dtype)


def _linear(x2, w, b, *, tile_rows=512):
    """x2: (rows, E), w: (E, D), b: (D,)  ->  (rows, D) in x2.dtype."""
    rows, e = x2.shape
    d = w.shape[1]
    tn = rows if rows <= tile_rows else tile_rows   # full extent or mult. of 8
    b2 = b.reshape(1, d)
    return pl.pallas_call(
        _linear_kernel,
        out_shape=jax.ShapeDtypeStruct((rows, d), x2.dtype),
        grid_spec=pltpu.PrefetchScalarGridSpec(
            num_scalar_prefetch=0,
            grid=(pl.cdiv(rows, tn),),
            in_specs=[
                pl.BlockSpec((tn, e), lambda i: (i, 0)),   # activations
                pl.BlockSpec((e, d), lambda i: (0, 0)),    # weight (resident)
                pl.BlockSpec((1, d), lambda i: (0, 0)),    # bias   (resident)
            ],
            out_specs=pl.BlockSpec((tn, d), lambda i: (i, 0)),
        ),
        compiler_params=pltpu.CompilerParams(
            dimension_semantics=("parallel",),
            vmem_limit_bytes=_VMEM_LIMIT),
    )(x2, w, b2)


# ----------------------------------------------------------------------------
# Stage 2: per-(batch, q-tile, head) attention + output-projection reduction.
# ----------------------------------------------------------------------------
def _attention_kernel(q_ref, k_ref, v_ref, wo_ref, bo_ref, out_ref, acc_ref):
    h = pl.program_id(2)

    @pl.when(h == 0)
    def _init():
        acc_ref[...] = jnp.zeros_like(acc_ref)

    q_h = q_ref[0, 0]          # (tq, hd) -- attention scale already folded in
    k_h = k_ref[0, 0]          # (Nk, hd)
    v_h = v_ref[0, 0]          # (Nk, hd)

    # scores = q_h @ k_h^T : contract the last axes directly (NT matmul on the
    # MXU), no materialized transpose.
    s = jax.lax.dot_general(
        q_h, k_h, (((1,), (1,)), ((), ())),
        preferred_element_type=jnp.float32)               # (tq, Nk) f32

    # Numerically stable softmax over keys; statistics stay in f32.
    s = s - jnp.max(s, axis=-1, keepdims=True)
    p = jnp.exp(s)
    p = p * pl.reciprocal(jnp.sum(p, axis=-1, keepdims=True), approx=True)

    # Per-head context, pushed through this head's slice of the output
    # projection and accumulated (replaces the H-way lane concat).
    ctx = jnp.dot(p.astype(v_h.dtype), v_h,
                  preferred_element_type=jnp.float32)     # (tq, hd)
    wo_h = wo_ref[0]                                      # (hd, E)
    acc_ref[...] += jnp.dot(ctx.astype(wo_h.dtype), wo_h,
                            preferred_element_type=jnp.float32)

    @pl.when(h == pl.num_programs(2) - 1)
    def _finalize():
        out_ref[0] = (acc_ref[...] + bo_ref[...]).astype(out_ref.dtype)


def attention_forward(q, k, v, params, num_heads):
    """q: (B, Nq, E), k/v: (B, Nk, E). Returns (B, Nq, E)."""
    wq, bq, wk, bk, wv, bv, wo, bo = params
    B, Nq, E = q.shape
    _, Nk, _ = k.shape
    D = wq.shape[1]                       # internal_dim
    assert D % num_heads == 0
    hd = D // num_heads
    scale = 1.0 / math.sqrt(hd)

    # ---- Stage 1: projections (scale folded into the q projection). ----
    qp = _linear(q.reshape(B * Nq, E), wq * scale, bq * scale)
    kp = _linear(k.reshape(B * Nk, E), wk, bk)
    vp = _linear(v.reshape(B * Nk, E), wv, bv)

    # ---- Wrapper-side layout plumbing (mirrors _separate_heads): head-major
    # (B, H, N, hd) so kernel blocks have full, (8,128)-legal minor dims. ----
    qph = qp.reshape(B, Nq, num_heads, hd).transpose(0, 2, 1, 3)
    kph = kp.reshape(B, Nk, num_heads, hd).transpose(0, 2, 1, 3)
    vph = vp.reshape(B, Nk, num_heads, hd).transpose(0, 2, 1, 3)
    wo3 = wo.reshape(num_heads, hd, E)    # per-head slices of the out proj
    bo2 = bo.reshape(1, E)

    # ---- Stage 2: attention core. ----
    tq = Nq if Nq <= 512 else 512         # 512 = multiple of 128 and 256
    grid = (B, pl.cdiv(Nq, tq), num_heads)   # heads last: reduction axis

    return pl.pallas_call(
        _attention_kernel,
        out_shape=jax.ShapeDtypeStruct((B, Nq, E), q.dtype),
        grid_spec=pltpu.PrefetchScalarGridSpec(
            num_scalar_prefetch=0,
            grid=grid,
            in_specs=[
                pl.BlockSpec((1, 1, tq, hd), lambda b, i, h: (b, h, i, 0)),  # q
                pl.BlockSpec((1, 1, Nk, hd), lambda b, i, h: (b, h, 0, 0)),  # k
                pl.BlockSpec((1, 1, Nk, hd), lambda b, i, h: (b, h, 0, 0)),  # v
                pl.BlockSpec((1, hd, E),     lambda b, i, h: (h, 0, 0)),     # Wo[h]
                pl.BlockSpec((1, E),         lambda b, i, h: (0, 0)),        # bo
            ],
            out_specs=pl.BlockSpec((1, tq, E), lambda b, i, h: (b, i, 0)),
            scratch_shapes=[pltpu.VMEM((tq, E), jnp.float32)],
        ),
        compiler_params=pltpu.CompilerParams(
            dimension_semantics=("parallel", "parallel", "arbitrary"),
            vmem_limit_bytes=_VMEM_LIMIT),
    )(qph, kph, vph, wo3, bo2)


# ----------------------------------------------------------------------------
# Plain-JAX reference matching the PyTorch module semantics.
# ----------------------------------------------------------------------------
def reference_forward(q, k, v, params, num_heads):
    wq, bq, wk, bk, wv, bv, wo, bo = params
    B, Nq, E = q.shape
    _, Nk, _ = k.shape
    D = wq.shape[1]
    hd = D // num_heads

    qp = q @ wq + bq
    kp = k @ wk + bk
    vp = v @ wv + bv

    def split(x, n):
        return x.reshape(B, n, num_heads, hd).transpose(0, 2, 1, 3)

    qh, kh, vh = split(qp, Nq), split(kp, Nk), split(vp, Nk)
    attn = jnp.einsum('bhqd,bhkd->bhqk', qh, kh) / math.sqrt(hd)
    attn = jax.nn.softmax(attn, axis=-1)
    out = jnp.einsum('bhqk,bhkd->bhqd', attn, vh)
    out = out.transpose(0, 2, 1, 3).reshape(B, Nq, D)
    return out @ wo + bo


def make_params(key, embedding_dim, internal_dim):
    """Deterministic Linear params; weights stored as (in, out) = W.T."""
    ks = jax.random.split(key, 8)
    def lin(kw, kb, fan_in, fan_out):
        bound = 1.0 / math.sqrt(fan_in)
        w = jax.random.uniform(kw, (fan_in, fan_out), jnp.float32, -bound, bound)
        b = jax.random.uniform(kb, (fan_out,), jnp.float32, -bound, bound)
        return w, b
    wq, bq = lin(ks[0], ks[1], embedding_dim, internal_dim)
    wk, bk = lin(ks[2], ks[3], embedding_dim, internal_dim)
    wv, bv = lin(ks[4], ks[5], embedding_dim, internal_dim)
    wo, bo = lin(ks[6], ks[7], internal_dim, embedding_dim)
    return (wq, bq, wk, bk, wv, bv, wo, bo)


if __name__ == "__main__":
    embedding_dim = 32
    num_heads = 4
    downsample_rate = 1
    internal_dim = embedding_dim // downsample_rate

    B, Nq, Nk = 2, 8, 8

    key = jax.random.PRNGKey(0)
    kq, kk, kv, kp = jax.random.split(key, 4)
    q = jax.random.normal(kq, (B, Nq, embedding_dim), jnp.float32)
    k = jax.random.normal(kk, (B, Nk, embedding_dim), jnp.float32)
    v = jax.random.normal(kv, (B, Nk, embedding_dim), jnp.float32)

    params = make_params(kp, embedding_dim, internal_dim)

    out = attention_forward(q, k, v, params, num_heads)
    out = jax.block_until_ready(out)

    ref = reference_forward(q, k, v, params, num_heads)
    assert out.shape == (B, Nq, embedding_dim)
    # Tolerance allows for the EUP approximate reciprocal in the softmax
    # normalization (well below the scale of any real implementation error).
    assert jnp.allclose(out, ref, atol=5e-3, rtol=5e-3), \
        f"max abs err {jnp.max(jnp.abs(out - ref))}"

    print("KERNEL_OK")
</pallas_src>

<mosaic_0001>
module attributes {stable_mosaic.version = 11 : i64} {
  func.func @_linear_kernel(%arg0: i32, %arg1: memref<16x32xf32, #tpu.memory_space<vmem>>, %arg2: memref<32x32xf32, #tpu.memory_space<vmem>>, %arg3: memref<1x32xf32, #tpu.memory_space<vmem>>, %arg4: memref<16x32xf32, #tpu.memory_space<vmem>>) attributes {dimension_semantics = [#tpu.dimension_semantics<parallel>], iteration_bounds = array<i64: 1>, scalar_prefetch = 0 : i64, scratch_operands = 0 : i64, tpu.core_type = #tpu.core_type<tc>, window_params = [{transform_indices = @transform_0, window_bounds = array<i64: 16, 32>}, {pipeline_mode = #tpu.pipeline_mode<synchronous>, transform_indices = @transform_1, window_bounds = array<i64: 32, 32>}, {pipeline_mode = #tpu.pipeline_mode<synchronous>, transform_indices = @transform_2, window_bounds = array<i64: 1, 32>}, {transform_indices = @transform_3, window_bounds = array<i64: 16, 32>}]} {
    %c0 = arith.constant 0 : index
    %c0_0 = arith.constant 0 : index
    %0 = vector.load %arg1[%c0, %c0_0] : memref<16x32xf32, #tpu.memory_space<vmem>>, vector<16x32xf32>
    %c0_1 = arith.constant 0 : index
    %c0_2 = arith.constant 0 : index
    %1 = vector.load %arg2[%c0_1, %c0_2] : memref<32x32xf32, #tpu.memory_space<vmem>>, vector<32x32xf32>
    %cst = arith.constant dense<0.000000e+00> : vector<16x32xf32>
    %2 = tpu.matmul %0, %1, %cst {dimension_numbers = #tpu.dot_dimension_numbers<[1], [0], [0], [1], [0, 0, 1, 1], [], []>} : vector<16x32xf32>, vector<32x32xf32>, vector<16x32xf32> -> vector<16x32xf32>
    %c0_3 = arith.constant 0 : index
    %c0_4 = arith.constant 0 : index
    %3 = vector.load %arg3[%c0_3, %c0_4] : memref<1x32xf32, #tpu.memory_space<vmem>>, vector<1x32xf32>
    %4 = vector.broadcast %3 : vector<1x32xf32> to vector<16x32xf32>
    %5 = arith.addf %2, %4 : vector<16x32xf32>
    %c0_5 = arith.constant 0 : index
    %c0_6 = arith.constant 0 : index
    %6 = vector.load %arg4[%c0_5, %c0_6] : memref<16x32xf32, #tpu.memory_space<vmem>>, vector<16x32xf32>
    tpu.vector_store %arg4[%c0_5, %c0_6], %5 {strides = array<i32>} : memref<16x32xf32, #tpu.memory_space<vmem>>, vector<16x32xf32>,
    return
  }
  func.func @transform_0(%arg0: i32) -> (i32, i32) {
    %c0_i32 = arith.constant 0 : i32
    %c0_i32_0 = arith.constant 0 : i32
    return %arg0, %c0_i32 : i32, i32
  }
  func.func @transform_1(%arg0: i32) -> (i32, i32) {
    %c0_i32 = arith.constant 0 : i32
    %c0_i32_0 = arith.constant 0 : i32
    %c0_i32_1 = arith.constant 0 : i32
    return %c0_i32, %c0_i32_0 : i32, i32
  }
  func.func @transform_2(%arg0: i32) -> (i32, i32) {
    %c0_i32 = arith.constant 0 : i32
    %c0_i32_0 = arith.constant 0 : i32
    %c0_i32_1 = arith.constant 0 : i32
    return %c0_i32, %c0_i32_0 : i32, i32
  }
  func.func @transform_3(%arg0: i32) -> (i32, i32) {
    %c0_i32 = arith.constant 0 : i32
    %c0_i32_0 = arith.constant 0 : i32
    return %arg0, %c0_i32 : i32, i32
  }
}

</mosaic_0001>

<bundles_post_ra>
// kernel: tpu_custom_call.1
= control target key start
LH: loop header
LB: loop body
LE: loop exit
PB: predicated region body
PF: predicated region fallthrough
CT: control target
= control target key end

     0   :  { %8 = vsyncpa [#allocation3], 0  ;;  %s340_s0 = inlined_call_operand.hbm [shape: f32[16,32], index: 0, kind: input, shape index: {}]   ;;  %s341_s1 = inlined_call_operand.hbm [shape: f32[32,32], index: 1, kind: input, shape index: {}]   ;;  %s342_s2 = inlined_call_operand.vmem [shape: f32[1,32], index: 2, kind: input, shape index: {}]   ;;  %s343_s3 = inlined_call_operand.hbm [shape: f32[16,32], index: 3, kind: output, shape index: {}]  }
   0x1   :  { %9 = vsyncpa [#allocation6], 0 }
   0x2   :  { %10 = vsyncpa [#allocation4], 0  ;;  %s263_s12 = smov [#allocation2]   ;;  %s191_s16 = scalar_lea.hbm %s340_s0, 256 }
   0x3   :  { %s16_s13 = sshll.u32 %s263_s12, 4  ;;  %p192_p0 = scmp.ne.s32.totalorder %s340_s0, %s191_s16  ;;  %s17_s13 = int_to_ptr.vmem [resolvable:$true] %s16_s13 }
   0x4   :  { %p195_p1 = scmp.lt.u32.totalorder %s191_s16, %s340_s0 }
   0x6   :  { %p197_p2 = pnand %p195_p1, %p192_p0 }
   0x8   :  { %200 = shalt.err (!%p197_p2)
}
   0x9   :  { %s201_s21 = scalar_lea.vmem %s17_s13, 256  ;;  %p206_p4 = scmp.lt.s32.totalorder %s17_s13, %s17_s13 }
   0xa   :  { %p202_p3 = scmp.ne.s32.totalorder %s17_s13, %s201_s21  ;;  %p207_p5 = scmp.lt.s32.totalorder %s201_s21, %s201_s21 }
   0xc   :  { %p208_p6 = por %p207_p5, %p206_p4 }
   0xe   :  { %p209_p7 = pnand %p208_p6, %p202_p3 }
  0x10   :  { %212 = shalt.err (!%p209_p7)
}
  0x11   :  { %s264_s22 = smov 128   ;;  %s265_s23 = smov 8  }
  0x12   :  { %22 = dma.hbm_to_vmem [thread:$0]  %s340_s0, 256, %s17_s13, [#allocation3], %s264_s22, %s264_s22, %s265_s23  }
  0x13   :  { %s266_s26 = smov [#allocation5]   ;;  %s213_s30 = scalar_lea.hbm %s341_s1, 512 }
  0x14   :  { %s28_s27 = sshll.u32 %s266_s26, 4  ;;  %p214_p8 = scmp.ne.s32.totalorder %s341_s1, %s213_s30  ;;  %s29_s27 = int_to_ptr.vmem [resolvable:$true] %s28_s27 }
  0x15   :  { %p217_p9 = scmp.lt.u32.totalorder %s213_s30, %s341_s1 }
  0x17   :  { %p219_p10 = pnand %p217_p9, %p214_p8 }
  0x19   :  { %222 = shalt.err (!%p219_p10)
}
  0x1a   :  { %s223_s8 = scalar_lea.vmem %s29_s27, 512  ;;  %p228_p12 = scmp.lt.s32.totalorder %s29_s27, %s29_s27 }
  0x1b   :  { %p224_p11 = scmp.ne.s32.totalorder %s29_s27, %s223_s8  ;;  %p229_p13 = scmp.lt.s32.totalorder %s223_s8, %s223_s8 }
  0x1d   :  { %p230_p0 = por %p229_p13, %p228_p12 }
  0x1f   :  { %p231_p1 = pnand %p230_p0, %p224_p11 }
  0x21   :  { %234 = shalt.err (!%p231_p1)
}
  0x22   :  { %34 = dma.hbm_to_vmem [thread:$0]  %s341_s1, 512, %s29_s27, [#allocation6], %s264_s22, %s264_s22, %s265_s23  }
  0x23   :  { %257 = dma.done.wait [#allocation3], 256  }
  0x24   :  { %258 = vsyncadd [#allocation3], 4294967040 }
  0x25   :  { %259 = dma.done.wait [#allocation6], 512  }
  0x26   :  { %260 = vsyncadd [#allocation6], 4294966784  ;;  %vm56_vm0 = vcmask 261120   ;;  %v45_v0 = vld [vmem:[#allocation5] sm:$0xff]  ;;  %v46_v1 = vld [vmem:[#allocation5 + $0x8] sm:$0xff]  ;;  %s267_s11 = smov [#allocation7]  }
  0x27   :  { %v47_v2 = vld [vmem:[#allocation5 + $0x10] sm:$0xff]  ;;  %v178_v3 = vpack.c.bf16 %v46_v1, %v45_v0  ;;  %v48_v4 = vld [vmem:[#allocation5 + $0x18] sm:$0xff]  ;;  %s145_s12 = sshll.u32 %s267_s11, 4  ;;  %s146_s12 = int_to_ptr.vmem [resolvable:$true] %s145_s12 }
  0x28   :  { %v43_v5 = vld [vmem:[#allocation2] sm:$0xff]  ;;  %v182_v6 = vpack.c.bf16 %v48_v4, %v47_v2  ;;  %v44_v7 = vld [vmem:[#allocation2 + $0x8] sm:$0xff]  ;;  %s235_s13 = scalar_lea.vmem %s146_s12, 256  ;;  %p240_p3 = scmp.lt.s32.totalorder %s146_s12, %s146_s12 }
  0x29   :  { %175 = vmatprep.mubr.msk.f32.mxu0 %vm56_vm0, %v43_v5  ;;  %179 = vmatprep.subr.bf16.mxu0 %v178_v3  ;;  %v158_v8 = vld [vmem:[%s342_s2] ss:$0 sm:$0xff]  ;;  %p236_p2 = scmp.ne.s32.totalorder %s146_s12, %s235_s13  ;;  %p241_p4 = scmp.lt.s32.totalorder %s235_s13, %s235_s13 }
  0x2a   :  { %181 = vmatpush3.bf16.msra.mxu0 %v178_v3 }
  0x2b   :  { %183 = vmatprep.subr.bf16.mxu0 %v182_v6  ;;  %p242_p5 = por %p241_p4, %p240_p3 }
  0x2d   :  { %p243_p6 = pnand %p242_p5, %p236_p2 }
  0x2e   :  { %185 = vmatpush3.bf16.msra.mxu0 %v182_v6 }
  0x31   :  { %176 = vmatmul.mubr.msk.f32.vlgmr.msra.gmra.mrb[0].mxu0 %vm56_vm0, %v44_v7 }
 0x104   :  { %v177_v9 = vpop.f32.mrb[0].mxu0 }
 0x105   :  { %v135_v10 = vadd.f32 %v177_v9, %v158_v8  ;;  %v129_v11 = vpop.f32.mrb[1].mxu0 }
 0x106   :  { %v130_v12 = vadd.f32 %v158_v8, %v129_v11 }
 0x107   :  { %139 = vst.msk [vmem:[#allocation7 + $0x8] sm:$0xff] %vm56_vm0, %v135_v10 }
 0x108   :  { %138 = vst.msk [vmem:[#allocation7] sm:$0xff] %vm56_vm0, %v130_v12 }
 0x109   :  { %246 = shalt.err (!%p243_p6)
}
 0x10a   :  { %s247_s15 = scalar_lea.hbm %s343_s3, 256 }
 0x10b   :  { %p248_p7 = scmp.ne.s32.totalorder %s343_s3, %s247_s15  ;;  %p251_p8 = scmp.lt.u32.totalorder %s247_s15, %s343_s3 }
 0x10d   :  { %p253_p9 = pnand %p251_p8, %p248_p7 }
 0x10f   :  { %256 = shalt.err (!%p253_p9)
}
 0x110   :  { %151 = dma.vmem_to_hbm [thread:$0]  %s146_s12, 256, %s343_s3, [#allocation4], %s264_s22, %s264_s22, %s265_s23  }
 0x111   :  { %261 = dma.done.wait [#allocation4], 256  }
 0x112   :  { %262 = vsyncadd [#allocation4], 4294967040 }
 0x113   :  { %155 = vsyncpa [#allocation3], 1 }
 0x114   :  { %156 = vsyncpa [#allocation6], 1 }
 0x115   :  { %157 = vsyncpa [#allocation4], 1 }

</bundles_post_ra>
